<compile_context>
chip_gen: v7x
topology: tpu7x:2x2x1
jax: 0.10.0
libtpu: 0.0.40
codegen_flags: <defaults>
</compile_context>

<pallas_src>
import functools

import jax
import jax.numpy as jnp
from jax.experimental import pallas as pl
from jax.experimental.pallas import tpu as pltpu

GIN_EPS = 0.1        # `eps` passed to NonParaGINConv
BN_EPS = 1e-5        # nn.BatchNorm1d default eps
NUM_LAYERS = 3       # `num_layer`
LANE = 128           # TPU lane width
SUBLANE = 8          # TPU sublane width


def _round_up(x, m):
    return (x + m - 1) // m * m


def _tokenizer_kernel(a_ref, x_ref, gamma_ref, beta_ref, out_ref,
                      *, num_layers, bn_eps, inv_n):
    """Tokenizer forward (JK='last') for a group of G graphs held in VMEM.

    a_ref:     (G, Np, Np) f32 dense adjacencies, (1+eps)*I already folded onto
               the real-node diagonal; padded node rows/cols are all zero.
    x_ref:     (G, Np, Dp) f32 node features, sublane/lane padded with zeros.
    gamma_ref: (L, Dp)     f32 BatchNorm weights (zero-padded lanes).
    beta_ref:  (L, Dp)     f32 BatchNorm biases  (zero-padded lanes).
    out_ref:   (G, Np, Dp) f32 output node tokens (last layer).
    """
    a = a_ref[...]                       # already f32 -- no redundant cast
    h = x_ref[...]
    gamma = gamma_ref[...]               # hoisted: load (L, Dp) once, slice in-register
    beta = beta_ref[...]

    for l in range(num_layers):          # static unroll; num_layers is a compile-time const
        # --- NonParaGINConv with folded self-term: h <- (A + (1+eps) I) @ h ---
        # Batched MXU matmuls over the G graphs in this block (f32 accumulate).
        h = jnp.einsum('gij,gjd->gid', a, h, preferred_element_type=jnp.float32)

        # --- Training-mode BatchNorm1d over each graph's nodes, fused into one FMA ---
        # Padded node rows of h are exactly zero here (their A' rows are zero),
        # so the sums only see real nodes; inv_n = 1 / real_node_count.
        mean = jnp.sum(h, axis=1, keepdims=True) * inv_n               # (G, 1, Dp)  XLU
        ex2 = jnp.sum(h * h, axis=1, keepdims=True) * inv_n            # (G, 1, Dp)  VPU+XLU
        var = jnp.maximum(ex2 - mean * mean, 0.0)                      # guard tiny negatives
        inv_std = jax.lax.rsqrt(var + bn_eps)                          # EUP (free slot)
        scale = gamma[l][None, None, :] * inv_std                      # (G, 1, Dp)
        offset = beta[l][None, None, :] - mean * scale                 # (G, 1, Dp)
        h = h * scale + offset                                         # one VPU FMA pass

    out_ref[...] = h                     # lane-dense (Dp multiple of 128) -> unmasked vst


def tokenizer_forward(adj, x, gamma, beta, *, num_layers=NUM_LAYERS,
                      gin_eps=GIN_EPS, bn_eps=BN_EPS, graphs_per_block=None):
    """Batched wrapper.

    adj:   (B, N, N) adjacency matrices (0/1, dst-major: adj[v, u] = 1 iff u->v)
    x:     (B, N, D) node features
    gamma: (L, D)    BatchNorm weights per layer
    beta:  (L, D)    BatchNorm biases per layer
    returns (B, N, D) last-layer node tokens (per-graph training-mode BN stats).
    """
    b, n, d = x.shape
    l = gamma.shape[0]
    n_p = _round_up(max(n, SUBLANE), SUBLANE)     # sublane-aligned node count
    d_p = _round_up(max(d, LANE), LANE)           # lane-dense feature width

    # Fold the GIN self-term onto the real-node diagonal (f32, exact), then zero-pad
    # nodes. Padded rows/cols of A' are all zero -> padded node rows of A'@h are zero,
    # so BN statistics over the node axis are unaffected by padding.
    adj_f = adj.astype(jnp.float32) + (1.0 + gin_eps) * jnp.eye(n, dtype=jnp.float32)[None]
    adj_f = jnp.pad(adj_f, ((0, 0), (0, n_p - n), (0, n_p - n)))
    x_p = jnp.pad(x.astype(jnp.float32), ((0, 0), (0, n_p - n), (0, d_p - d)))
    gamma_p = jnp.pad(gamma.astype(jnp.float32), ((0, 0), (0, d_p - d)))
    beta_p = jnp.pad(beta.astype(jnp.float32), ((0, 0), (0, d_p - d)))

    # Graphs per grid step: amortize per-step overhead while comfortably fitting the
    # double-buffered in/out tiles in VMEM and keeping >= 2 steps for megacore sharding.
    if graphs_per_block is None:
        per_graph_bytes = 4 * (n_p * n_p + 2 * n_p * d_p) * 2     # in + out, double-buffered
        g = max(1, min(b, (8 * 1024 * 1024) // max(per_graph_bytes, 1)))
        if b > 1:
            g = max(1, min(g, (b + 1) // 2))                      # keep at least 2 grid steps
    else:
        g = max(1, min(b, graphs_per_block))
    b_p = _round_up(b, g)
    if b_p != b:
        # Padded graphs are all-zero (adjacency and features): their BN stays finite
        # (var=0 -> rsqrt(eps)) and they are sliced off below.
        adj_f = jnp.pad(adj_f, ((0, b_p - b), (0, 0), (0, 0)))
        x_p = jnp.pad(x_p, ((0, b_p - b), (0, 0), (0, 0)))

    kernel = functools.partial(_tokenizer_kernel, num_layers=num_layers,
                               bn_eps=bn_eps, inv_n=1.0 / n)

    out = pl.pallas_call(
        kernel,
        out_shape=jax.ShapeDtypeStruct((b_p, n_p, d_p), jnp.float32),
        grid_spec=pl.GridSpec(
            grid=(b_p // g,),   # one grid step per group of graphs; pipelined + megacore
            in_specs=[
                pl.BlockSpec((g, n_p, n_p), lambda i: (i, 0, 0)),
                pl.BlockSpec((g, n_p, d_p), lambda i: (i, 0, 0)),
                pl.BlockSpec((l, d_p), lambda i: (0, 0)),
                pl.BlockSpec((l, d_p), lambda i: (0, 0)),
            ],
            out_specs=pl.BlockSpec((g, n_p, d_p), lambda i: (i, 0, 0)),
        ),
        compiler_params=pltpu.CompilerParams(
            dimension_semantics=("parallel",)),   # graph groups are independent
    )(adj_f, x_p, gamma_p, beta_p)

    return out[:b, :n, :d]


def tokenizer_reference(adj, x, gamma, beta,
                        *, num_layers=NUM_LAYERS, gin_eps=GIN_EPS, bn_eps=BN_EPS):
    """Pure-JAX reference matching the PyTorch forward (JK='last'), vmapped over graphs."""
    def single(a, h):
        for layer in range(num_layers):
            neigh = jnp.dot(a, h, precision=jax.lax.Precision.HIGHEST)
            h = (1.0 + gin_eps) * h + neigh
            mean = jnp.mean(h, axis=0, keepdims=True)
            var = jnp.mean((h - mean) ** 2, axis=0, keepdims=True)   # biased, like BN
            h = (h - mean) / jnp.sqrt(var + bn_eps)
            h = h * gamma[layer][None, :] + beta[layer][None, :]
        return h
    return jax.vmap(single, in_axes=(0, 0))(adj.astype(jnp.float32), x.astype(jnp.float32))


if __name__ == "__main__":
    B = 8    # number of graphs
    N = 16   # number of nodes per graph
    D = 32   # emb_dim

    key = jax.random.PRNGKey(0)
    k_adj, k_x, k_g, k_b = jax.random.split(key, 4)

    # Deterministic random undirected graphs (dense adjacency, no self loops).
    upper = (jax.random.uniform(k_adj, (B, N, N)) < 0.3).astype(jnp.float32)
    upper = jnp.triu(upper, k=1)
    adj = upper + jnp.swapaxes(upper, -1, -2)                 # (B, N_dst, N_src)

    x = jax.random.normal(k_x, (B, N, D), dtype=jnp.float32)  # node features

    # BatchNorm affine params per layer (deterministic synthetic init).
    gamma = 1.0 + 0.1 * jax.random.normal(k_g, (NUM_LAYERS, D), dtype=jnp.float32)
    beta = 0.1 * jax.random.normal(k_b, (NUM_LAYERS, D), dtype=jnp.float32)

    out = tokenizer_forward(adj, x, gamma, beta)
    out = jax.block_until_ready(out)

    ref = tokenizer_reference(adj, x, gamma, beta)
    assert out.shape == (B, N, D)
    assert jnp.allclose(out, ref, atol=2e-4, rtol=2e-4), "mismatch vs reference"

    print("KERNEL_OK")
</pallas_src>

<mosaic_0001>
module attributes {stable_mosaic.version = 11 : i64} {
  func.func @_tokenizer_kernel(%arg0: i32, %arg1: memref<4x16x16xf32, #tpu.memory_space<vmem>>, %arg2: memref<4x16x128xf32, #tpu.memory_space<vmem>>, %arg3: memref<3x128xf32, #tpu.memory_space<vmem>>, %arg4: memref<3x128xf32, #tpu.memory_space<vmem>>, %arg5: memref<4x16x128xf32, #tpu.memory_space<vmem>>) attributes {dimension_semantics = [#tpu.dimension_semantics<parallel>], iteration_bounds = array<i64: 2>, scalar_prefetch = 0 : i64, scratch_operands = 0 : i64, tpu.core_type = #tpu.core_type<tc>, window_params = [{transform_indices = @transform_0, window_bounds = array<i64: 4, 16, 16>}, {transform_indices = @transform_1, window_bounds = array<i64: 4, 16, 128>}, {pipeline_mode = #tpu.pipeline_mode<synchronous>, transform_indices = @transform_2, window_bounds = array<i64: 3, 128>}, {pipeline_mode = #tpu.pipeline_mode<synchronous>, transform_indices = @transform_3, window_bounds = array<i64: 3, 128>}, {transform_indices = @transform_4, window_bounds = array<i64: 4, 16, 128>}]} {
    %c0 = arith.constant 0 : index
    %c0_0 = arith.constant 0 : index
    %c0_1 = arith.constant 0 : index
    %0 = vector.load %arg1[%c0, %c0_0, %c0_1] : memref<4x16x16xf32, #tpu.memory_space<vmem>>, vector<4x16x16xf32>
    %c0_2 = arith.constant 0 : index
    %c0_3 = arith.constant 0 : index
    %c0_4 = arith.constant 0 : index
    %1 = vector.load %arg2[%c0_2, %c0_3, %c0_4] : memref<4x16x128xf32, #tpu.memory_space<vmem>>, vector<4x16x128xf32>
    %c0_5 = arith.constant 0 : index
    %c0_6 = arith.constant 0 : index
    %2 = vector.load %arg3[%c0_5, %c0_6] : memref<3x128xf32, #tpu.memory_space<vmem>>, vector<3x128xf32>
    %c0_7 = arith.constant 0 : index
    %c0_8 = arith.constant 0 : index
    %3 = vector.load %arg4[%c0_7, %c0_8] : memref<3x128xf32, #tpu.memory_space<vmem>>, vector<3x128xf32>
    "tpu.trace_start"() <{level = 10 : i32, message = "gij,gjd->gid"}> : () -> ()
    %cst = arith.constant dense<0.000000e+00> : vector<4x16x128xf32>
    %4 = tpu.matmul %0, %1, %cst {dimension_numbers = #tpu.dot_dimension_numbers<[2], [1], [1], [2], [0, 0, 0, 1, 1, 2], [0], [0]>} : vector<4x16x16xf32>, vector<4x16x128xf32>, vector<4x16x128xf32> -> vector<4x16x128xf32>
    "tpu.trace_stop"() : () -> ()
    %cst_9 = arith.constant dense<0.000000e+00> : vector<4x128xf32>
    %5 = vector.multi_reduction <add>, %4, %cst_9 [1] : vector<4x16x128xf32> to vector<4x128xf32>
    %6 = vector.shape_cast %5 : vector<4x128xf32> to vector<4x1x128xf32>
    %cst_10 = arith.constant 6.250000e-02 : f32
    %7 = vector.broadcast %cst_10 : f32 to vector<4x1x128xf32>
    %8 = arith.mulf %6, %7 : vector<4x1x128xf32>
    %9 = arith.mulf %4, %4 : vector<4x16x128xf32>
    %cst_11 = arith.constant dense<0.000000e+00> : vector<4x128xf32>
    %10 = vector.multi_reduction <add>, %9, %cst_11 [1] : vector<4x16x128xf32> to vector<4x128xf32>
    %11 = vector.shape_cast %10 : vector<4x128xf32> to vector<4x1x128xf32>
    %cst_12 = arith.constant 6.250000e-02 : f32
    %12 = vector.broadcast %cst_12 : f32 to vector<4x1x128xf32>
    %13 = arith.mulf %11, %12 : vector<4x1x128xf32>
    %14 = arith.mulf %8, %8 : vector<4x1x128xf32>
    %15 = arith.subf %13, %14 : vector<4x1x128xf32>
    %cst_13 = arith.constant 0.000000e+00 : f32
    %16 = vector.broadcast %cst_13 : f32 to vector<4x1x128xf32>
    %17 = arith.maximumf %15, %16 : vector<4x1x128xf32>
    %cst_14 = arith.constant 9.99999974E-6 : f32
    %18 = vector.broadcast %cst_14 : f32 to vector<4x1x128xf32>
    %19 = arith.addf %17, %18 : vector<4x1x128xf32>
    %20 = math.rsqrt %19 : vector<4x1x128xf32>
    %21 = vector.extract_strided_slice %2 {offsets = [0, 0], sizes = [1, 128], strides = [1, 1]} : vector<3x128xf32> to vector<1x128xf32>
    %22 = vector.shape_cast %21 : vector<1x128xf32> to vector<128xf32>
    %23 = vector.shape_cast %22 : vector<128xf32> to vector<1x1x128xf32>
    %24 = vector.broadcast %23 : vector<1x1x128xf32> to vector<4x1x128xf32>
    %25 = arith.mulf %24, %20 : vector<4x1x128xf32>
    %26 = vector.extract_strided_slice %3 {offsets = [0, 0], sizes = [1, 128], strides = [1, 1]} : vector<3x128xf32> to vector<1x128xf32>
    %27 = vector.shape_cast %26 : vector<1x128xf32> to vector<128xf32>
    %28 = vector.shape_cast %27 : vector<128xf32> to vector<1x1x128xf32>
    %29 = arith.mulf %8, %25 : vector<4x1x128xf32>
    %30 = vector.broadcast %28 : vector<1x1x128xf32> to vector<4x1x128xf32>
    %31 = arith.subf %30, %29 : vector<4x1x128xf32>
    %32 = vector.broadcast %25 : vector<4x1x128xf32> to vector<4x16x128xf32>
    %33 = arith.mulf %4, %32 : vector<4x16x128xf32>
    %34 = vector.broadcast %31 : vector<4x1x128xf32> to vector<4x16x128xf32>
    %35 = arith.addf %33, %34 : vector<4x16x128xf32>
    "tpu.trace_start"() <{level = 10 : i32, message = "gij,gjd->gid"}> : () -> ()
    %cst_15 = arith.constant dense<0.000000e+00> : vector<4x16x128xf32>
    %36 = tpu.matmul %0, %35, %cst_15 {dimension_numbers = #tpu.dot_dimension_numbers<[2], [1], [1], [2], [0, 0, 0, 1, 1, 2], [0], [0]>} : vector<4x16x16xf32>, vector<4x16x128xf32>, vector<4x16x128xf32> -> vector<4x16x128xf32>
    "tpu.trace_stop"() : () -> ()
    %cst_16 = arith.constant dense<0.000000e+00> : vector<4x128xf32>
    %37 = vector.multi_reduction <add>, %36, %cst_16 [1] : vector<4x16x128xf32> to vector<4x128xf32>
    %38 = vector.shape_cast %37 : vector<4x128xf32> to vector<4x1x128xf32>
    %cst_17 = arith.constant 6.250000e-02 : f32
    %39 = vector.broadcast %cst_17 : f32 to vector<4x1x128xf32>
    %40 = arith.mulf %38, %39 : vector<4x1x128xf32>
    %41 = arith.mulf %36, %36 : vector<4x16x128xf32>
    %cst_18 = arith.constant dense<0.000000e+00> : vector<4x128xf32>
    %42 = vector.multi_reduction <add>, %41, %cst_18 [1] : vector<4x16x128xf32> to vector<4x128xf32>
    %43 = vector.shape_cast %42 : vector<4x128xf32> to vector<4x1x128xf32>
    %cst_19 = arith.constant 6.250000e-02 : f32
    %44 = vector.broadcast %cst_19 : f32 to vector<4x1x128xf32>
    %45 = arith.mulf %43, %44 : vector<4x1x128xf32>
    %46 = arith.mulf %40, %40 : vector<4x1x128xf32>
    %47 = arith.subf %45, %46 : vector<4x1x128xf32>
    %cst_20 = arith.constant 0.000000e+00 : f32
    %48 = vector.broadcast %cst_20 : f32 to vector<4x1x128xf32>
    %49 = arith.maximumf %47, %48 : vector<4x1x128xf32>
    %cst_21 = arith.constant 9.99999974E-6 : f32
    %50 = vector.broadcast %cst_21 : f32 to vector<4x1x128xf32>
    %51 = arith.addf %49, %50 : vector<4x1x128xf32>
    %52 = math.rsqrt %51 : vector<4x1x128xf32>
    %53 = vector.extract_strided_slice %2 {offsets = [1, 0], sizes = [1, 128], strides = [1, 1]} : vector<3x128xf32> to vector<1x128xf32>
    %54 = vector.shape_cast %53 : vector<1x128xf32> to vector<128xf32>
    %55 = vector.shape_cast %54 : vector<128xf32> to vector<1x1x128xf32>
    %56 = vector.broadcast %55 : vector<1x1x128xf32> to vector<4x1x128xf32>
    %57 = arith.mulf %56, %52 : vector<4x1x128xf32>
    %58 = vector.extract_strided_slice %3 {offsets = [1, 0], sizes = [1, 128], strides = [1, 1]} : vector<3x128xf32> to vector<1x128xf32>
    %59 = vector.shape_cast %58 : vector<1x128xf32> to vector<128xf32>
    %60 = vector.shape_cast %59 : vector<128xf32> to vector<1x1x128xf32>
    %61 = arith.mulf %40, %57 : vector<4x1x128xf32>
    %62 = vector.broadcast %60 : vector<1x1x128xf32> to vector<4x1x128xf32>
    %63 = arith.subf %62, %61 : vector<4x1x128xf32>
    %64 = vector.broadcast %57 : vector<4x1x128xf32> to vector<4x16x128xf32>
    %65 = arith.mulf %36, %64 : vector<4x16x128xf32>
    %66 = vector.broadcast %63 : vector<4x1x128xf32> to vector<4x16x128xf32>
    %67 = arith.addf %65, %66 : vector<4x16x128xf32>
    "tpu.trace_start"() <{level = 10 : i32, message = "gij,gjd->gid"}> : () -> ()
    %cst_22 = arith.constant dense<0.000000e+00> : vector<4x16x128xf32>
    %68 = tpu.matmul %0, %67, %cst_22 {dimension_numbers = #tpu.dot_dimension_numbers<[2], [1], [1], [2], [0, 0, 0, 1, 1, 2], [0], [0]>} : vector<4x16x16xf32>, vector<4x16x128xf32>, vector<4x16x128xf32> -> vector<4x16x128xf32>
    "tpu.trace_stop"() : () -> ()
    %cst_23 = arith.constant dense<0.000000e+00> : vector<4x128xf32>
    %69 = vector.multi_reduction <add>, %68, %cst_23 [1] : vector<4x16x128xf32> to vector<4x128xf32>
    %70 = vector.shape_cast %69 : vector<4x128xf32> to vector<4x1x128xf32>
    %cst_24 = arith.constant 6.250000e-02 : f32
    %71 = vector.broadcast %cst_24 : f32 to vector<4x1x128xf32>
    %72 = arith.mulf %70, %71 : vector<4x1x128xf32>
    %73 = arith.mulf %68, %68 : vector<4x16x128xf32>
    %cst_25 = arith.constant dense<0.000000e+00> : vector<4x128xf32>
    %74 = vector.multi_reduction <add>, %73, %cst_25 [1] : vector<4x16x128xf32> to vector<4x128xf32>
    %75 = vector.shape_cast %74 : vector<4x128xf32> to vector<4x1x128xf32>
    %cst_26 = arith.constant 6.250000e-02 : f32
    %76 = vector.broadcast %cst_26 : f32 to vector<4x1x128xf32>
    %77 = arith.mulf %75, %76 : vector<4x1x128xf32>
    %78 = arith.mulf %72, %72 : vector<4x1x128xf32>
    %79 = arith.subf %77, %78 : vector<4x1x128xf32>
    %cst_27 = arith.constant 0.000000e+00 : f32
    %80 = vector.broadcast %cst_27 : f32 to vector<4x1x128xf32>
    %81 = arith.maximumf %79, %80 : vector<4x1x128xf32>
    %cst_28 = arith.constant 9.99999974E-6 : f32
    %82 = vector.broadcast %cst_28 : f32 to vector<4x1x128xf32>
    %83 = arith.addf %81, %82 : vector<4x1x128xf32>
    %84 = math.rsqrt %83 : vector<4x1x128xf32>
    %85 = vector.extract_strided_slice %2 {offsets = [2, 0], sizes = [1, 128], strides = [1, 1]} : vector<3x128xf32> to vector<1x128xf32>
    %86 = vector.shape_cast %85 : vector<1x128xf32> to vector<128xf32>
    %87 = vector.shape_cast %86 : vector<128xf32> to vector<1x1x128xf32>
    %88 = vector.broadcast %87 : vector<1x1x128xf32> to vector<4x1x128xf32>
    %89 = arith.mulf %88, %84 : vector<4x1x128xf32>
    %90 = vector.extract_strided_slice %3 {offsets = [2, 0], sizes = [1, 128], strides = [1, 1]} : vector<3x128xf32> to vector<1x128xf32>
    %91 = vector.shape_cast %90 : vector<1x128xf32> to vector<128xf32>
    %92 = vector.shape_cast %91 : vector<128xf32> to vector<1x1x128xf32>
    %93 = arith.mulf %72, %89 : vector<4x1x128xf32>
    %94 = vector.broadcast %92 : vector<1x1x128xf32> to vector<4x1x128xf32>
    %95 = arith.subf %94, %93 : vector<4x1x128xf32>
    %96 = vector.broadcast %89 : vector<4x1x128xf32> to vector<4x16x128xf32>
    %97 = arith.mulf %68, %96 : vector<4x16x128xf32>
    %98 = vector.broadcast %95 : vector<4x1x128xf32> to vector<4x16x128xf32>
    %99 = arith.addf %97, %98 : vector<4x16x128xf32>
    %c0_29 = arith.constant 0 : index
    %c0_30 = arith.constant 0 : index
    %c0_31 = arith.constant 0 : index
    %100 = vector.load %arg5[%c0_29, %c0_30, %c0_31] : memref<4x16x128xf32, #tpu.memory_space<vmem>>, vector<4x16x128xf32>
    tpu.vector_store %arg5[%c0_29, %c0_30, %c0_31], %99 {strides = array<i32>} : memref<4x16x128xf32, #tpu.memory_space<vmem>>, vector<4x16x128xf32>,
    return
  }
  func.func @transform_0(%arg0: i32) -> (i32, i32, i32) {
    %c0_i32 = arith.constant 0 : i32
    %c0_i32_0 = arith.constant 0 : i32
    %c0_i32_1 = arith.constant 0 : i32
    return %arg0, %c0_i32, %c0_i32_0 : i32, i32, i32
  }
  func.func @transform_1(%arg0: i32) -> (i32, i32, i32) {
    %c0_i32 = arith.constant 0 : i32
    %c0_i32_0 = arith.constant 0 : i32
    %c0_i32_1 = arith.constant 0 : i32
    return %arg0, %c0_i32, %c0_i32_0 : i32, i32, i32
  }
  func.func @transform_2(%arg0: i32) -> (i32, i32) {
    %c0_i32 = arith.constant 0 : i32
    %c0_i32_0 = arith.constant 0 : i32
    %c0_i32_1 = arith.constant 0 : i32
    return %c0_i32, %c0_i32_0 : i32, i32
  }
  func.func @transform_3(%arg0: i32) -> (i32, i32) {
    %c0_i32 = arith.constant 0 : i32
    %c0_i32_0 = arith.constant 0 : i32
    %c0_i32_1 = arith.constant 0 : i32
    return %c0_i32, %c0_i32_0 : i32, i32
  }
  func.func @transform_4(%arg0: i32) -> (i32, i32, i32) {
    %c0_i32 = arith.constant 0 : i32
    %c0_i32_0 = arith.constant 0 : i32
    %c0_i32_1 = arith.constant 0 : i32
    return %arg0, %c0_i32, %c0_i32_0 : i32, i32, i32
  }
}

</mosaic_0001>

<bundles_post_ra>
// kernel: tpu_custom_call.1
= control target key start
LH: loop header
LB: loop body
LE: loop exit
PB: predicated region body
PF: predicated region fallthrough
CT: control target
= control target key end

     0   :  { %9 = vsyncpa [#allocation3], 0  ;;  %s2738_s0 = inlined_call_operand.hbm [shape: f32[8,16,16], index: 0, kind: input, shape index: {}]   ;;  %s2739_s1 = inlined_call_operand.hbm [shape: f32[8,16,128], index: 1, kind: input, shape index: {}]   ;;  %s2740_s2 = inlined_call_operand.vmem [shape: f32[3,128], index: 2, kind: input, shape index: {}]   ;;  %s2741_s3 = inlined_call_operand.vmem [shape: f32[3,128], index: 3, kind: input, shape index: {}]   ;;  %s2742_s4 = inlined_call_operand.hbm [shape: f32[8,16,128], index: 4, kind: output, shape index: {}]  }
   0x1   :  { %11 = vsyncpa [#allocation3 + $0x1], 0 }
   0x2   :  { %12 = vsyncpa [#allocation6], 0 }
   0x3   :  { %14 = vsyncpa [#allocation6 + $0x1], 0 }
   0x4   :  { %15 = vsyncpa [#allocation4], 0 }
   0x5   :  { %17 = vsyncpa [#allocation4 + $0x1], 0  ;;  %s2253_s15 = smov 0   ;;  %s2255_s16 = smov 0  }
   0x6   :  { %s2257_s17 = smov 0   ;;  %s2259_s18 = smov 0  }
   0x7 LB: > { %s2274_s19 = sadd.s32 4294967295, %s2219_s18   ;;  %s1779_s20 = sadd.s32 4294967294, %s2219_s18   ;;  %s2219_s18 = sphi %s2259_s18, %s2758_s18   ;;  %s2215_s17 = sphi %s2257_s17, %s2757_s17   ;;  %s2211_s16 = sphi %s2255_s16, %s2756_s16   ;;  %s2207_s15 = sphi %s2253_s15, %s2755_s15  }
   0x8   : > { %s2278_s21 = sadd.s32 1, %s2219_s18   ;;  %s30_s22 = sadd.s32 1, %s2215_s17 }
   0x9   : > { %s27_s23 = ssub.s32 %s2219_s18, %s2278_s21  ;;  %p37_p0 = scmp.ne.s32.totalorder %s2215_s17, %s2211_s16 }
   0xa   : > { %p28_p1 = scmp.eq.s32.totalorder %s27_s23, 0  ;;  %p38_p2 = scmp.eq.s32.totalorder %s2219_s18, 0 }
   0xb   : > { %p43_p3 = scmp.ne.s32.totalorder %s2211_s16, %s2207_s15  ;;  %p44_p4 = scmp.eq.s32.totalorder %s2274_s19, 0 }
   0xc   : > { %s2290_s24 = scalar_select %p28_p1, %s2215_s17, %s30_s22  }
   0xd   : > { %p2292_p5 = por %p38_p2, %p37_p0  ;;  %p2296_p6 = por %p44_p4, %p43_p3 }
   0xe   : > { %p135_p7 = scmp.eq.s32.totalorder %s2274_s19, 1  ;;  %p141_p8 = scmp.eq.s32.totalorder %s1779_s20, 1 }
   0xf   : > { %s2746_s26 = scalar_select %p2296_p6, 1, 0 }
  0x10   : > { %p2027_p10 = scmp.lt.s32.totalorder %s2219_s18, 2  ;;  %p2303_p11 = por %p135_p7, %p37_p0 }
  0x11   : > { %p2307_p12 = por %p141_p8, %p43_p3  ;;  %s2312_s29 = sand.u32 1, %s2215_s17  }
  0x12   : > { %s2747_s27 = scalar_select %p2303_p11, 1, 0 }
  0x13   : > { %s2748_s28 = scalar_select %p2307_p12, 1, 0 }
  0x14   : > { %s1825_s30 = sshll.u32 %s2219_s18, 10  ;;  %s1782_s5 = sshll.u32 %s2312_s29, 6 }
  0x15   : > { %s2321_s8 = scalar_lea.hbm %s2738_s0, %s1825_s30  ;;  %s171_s9 = scalar_lea.vmem [#allocation2], %s1782_s5 }
  0x16   : > { %s179_s10 = sshll.u32 %s171_s9, 4  ;;  %p2327_p13 = pnand %p2027_p10, %p2292_p5  ;;  %s2331_s10 = int_to_ptr.vmem [resolvable:$true] %s179_s10 }
  0x17   : > { %s168_s12 = scalar_lea.sflag [#allocation3], %s2312_s29  ;;  %s2089_s13 = scalar_lea.hbm %s2321_s8, 1024 }
  0x18   : > { %p2090_p0 = scmp.ne.s32.totalorder %s2321_s8, %s2089_s13  ;;  %p2091_p1 = pneg %p2327_p13 }
  0x19   : > { %s2094_s22 = scalar_lea.hbm %s2738_s0, 2048  ;;  %p2095_p4 = scmp.lt.u32.totalorder %s2321_s8, %s2738_s0 }
  0x1a   : > { %p2092_p2 = pnand %p2091_p1, %p2090_p0  ;;  %p2096_p5 = scmp.lt.u32.totalorder %s2094_s22, %s2089_s13 }
  0x1b   : > { %p2098_p8 = scmp.lt.u32.totalorder %s2089_s13, %s2321_s8 }
  0x1c   : > { %p2093_p3 = pneg %p2092_p2  ;;  %p2097_p7 = por %p2096_p5, %p2095_p4 }
  0x1e   : > { %p2099_p10 = por %p2098_p8, %p2097_p7 }
  0x20   : > { %p2100_p9 = pnand %p2099_p10, %p2093_p3 }
  0x22   : > { %2103 = shalt.err (!%p2100_p9)
}
  0x23   : > { %s2104_s6 = scalar_lea.vmem %s2331_s10, 1024  ;;  %s2221_s7 = smov [#allocation2]  }
  0x24   : > { %p2105_p0 = scmp.ne.s32.totalorder %s2331_s10, %s2104_s6  ;;  %s2109_s9 = sshll.u32 %s2221_s7, 4  ;;  %s2110_s9 = int_to_ptr.vmem [resolvable:$false] %s2109_s9 }
  0x25   : > { %s2111_s14 = scalar_lea.vmem %s2110_s9, 2048  ;;  %p2112_p11 = scmp.lt.s32.totalorder %s2331_s10, %s2110_s9 }
  0x26   : > { %p2107_p2 = pnand %p2105_p0, %p2091_p1  ;;  %p2113_p4 = scmp.lt.s32.totalorder %s2111_s14, %s2104_s6 }
  0x28   : > { %p2108_p12 = pneg %p2107_p2  ;;  %p2114_p5 = por %p2113_p4, %p2112_p11 }
  0x2a   : > { %p2115_p7 = pnand %p2114_p5, %p2108_p12 }
  0x2c   : > { %2118 = shalt.err (!%p2115_p7)
}
  0x2d   : > { %s2222_s13 = smov 128   ;;  %s2223_s20 = smov 8  }
  0x2e   : > { %2019 = dma.hbm_to_vmem [thread:$0]  (!%p2327_p13), %s2321_s8, 1024, %s2331_s10, %s168_s12, %s2222_s13, %s2222_s13, %s2223_s20  }
  0x2f   : > { %p1790_p9 = scmp.ge.s32.totalorder %s2219_s18, 1  ;;  %p209_p11 = scmp.lt.s32.totalorder %s2219_s18, 3 }
  0x30   : > { %s2375_s6 = scalar_lea.hbm %s2739_s1, %s1825_s30  ;;  %s193_s7 = scalar_lea.vmem [#allocation5], %s1782_s5 }
  0x31   : > { %p2366_p12 = pnand %p1790_p9, %p209_p11  ;;  %s201_s9 = sshll.u32 %s193_s7, 4  ;;  %s2379_s9 = int_to_ptr.vmem [resolvable:$true] %s201_s9 }
  0x32   : > { %s190_s8 = scalar_lea.sflag [#allocation6], %s2312_s29  ;;  %s2119_s10 = scalar_lea.hbm %s2375_s6, 1024 }
  0x33   : > { %p2120_p3 = scmp.ne.s32.totalorder %s2375_s6, %s2119_s10  ;;  %s2124_s30 = scalar_lea.hbm %s2739_s1, 2048 }
  0x34   : > { %p2125_p0 = scmp.lt.u32.totalorder %s2375_s6, %s2739_s1  ;;  %p2126_p2 = scmp.lt.u32.totalorder %s2124_s30, %s2119_s10 }
  0x35   : > { %p2122_p8 = pnand %p2120_p3, %p2091_p1  ;;  %p2128_p5 = scmp.lt.u32.totalorder %s2119_s10, %s2375_s6 }
  0x36   : > { %p2127_p4 = por %p2126_p2, %p2125_p0 }
  0x37   : > { %p2123_p10 = pneg %p2122_p8 }
  0x38   : > { %p2129_p7 = por %p2128_p5, %p2127_p4 }
  0x3a   : > { %p2130_p9 = pnand %p2129_p7, %p2123_p10 }
  0x3c   : > { %2133 = shalt.err (!%p2130_p9)
}
  0x3d   : > { %s2134_s5 = scalar_lea.vmem %s2379_s9, 1024  ;;  %s2224_s7 = smov [#allocation5]  }
  0x3e   : > { %p2135_p11 = scmp.ne.s32.totalorder %s2379_s9, %s2134_s5  ;;  %s2139_s12 = sshll.u32 %s2224_s7, 4  ;;  %s2140_s12 = int_to_ptr.vmem [resolvable:$false] %s2139_s12 }
  0x3f   : > { %s2141_s14 = scalar_lea.vmem %s2140_s12, 2048  ;;  %p2142_p6 = scmp.lt.s32.totalorder %s2379_s9, %s2140_s12 }
  0x40   : > { %p2137_p3 = pnand %p2135_p11, %p2091_p1  ;;  %p2143_p0 = scmp.lt.s32.totalorder %s2141_s14, %s2134_s5 }
  0x42   : > { %p2138_p8 = pneg %p2137_p3  ;;  %p2144_p2 = por %p2143_p0, %p2142_p6 }
  0x44   : > { %p2145_p4 = pnand %p2144_p2, %p2138_p8 }
  0x46   : > { %2148 = shalt.err (!%p2145_p4)
}
  0x47   : > { %2022 = dma.hbm_to_vmem [thread:$0]  (!%p2327_p13), %s2375_s6, 1024, %s2379_s9, %s190_s8, %s2222_s13, %s2222_s13, %s2223_s20  }
  0x48   : > { %213 = sbr.rel (%p2366_p12) target bundleno = 900 (0x384), region = 36  ;;  %s2413_s10 = sand.u32 (!%p2366_p12), 1, %s2211_s16  }
  0x49   : > { %s2416_s30 = sshll.u32 (!%p2366_p12), %s2413_s10, 6  ;;  %s216_s11 = scalar_lea.sflag (!%p2366_p12), [#allocation3], %s2413_s10 }
  0x4a   : > { %s2420_s23 = scalar_lea.vmem (!%p2366_p12), [#allocation2], %s2416_s30  ;;  %p2751_p6 = scmp.ne.s32.totalorder (!%p2366_p12), %s2746_s26, 0 }
  0x4f   : > { %2194 = dma.done.wait (%p2751_p6), %s216_s11, 1024  }
  0x50   : > { %2196 = vsyncadd (%p2751_p6), %s216_s11, 4294966272  ;;  %s225_s29 = scalar_lea.sflag [#allocation6], %s2413_s10  ;;  %s228_s13 = scalar_lea.vmem [#allocation5], %s2416_s30 }
  0x51   : > { %2198 = dma.done.wait (%p2751_p6), %s225_s29, 1024  }
  0x52   : > { %2200 = vsyncadd (%p2751_p6), %s225_s29, 4294966272  ;;  %vm279_vm0 = vcmask 130048   ;;  %v269_v0 = vld [vmem:[%s228_s13] sm:$0xff]  ;;  %v270_v1 = vld [vmem:[%s228_s13 + $0x8] sm:$0xff]  ;;  %s257_s9 = scalar_lea.vmem [#allocation7], %s2416_s30  ;;  %s1829_s8 = sshll.u32 %s2274_s19, 10 }
  0x53   : > { %v271_v2 = vld [vmem:[%s228_s13 + $0x10] sm:$0xff]  ;;  %v1962_v3 = vpack.c.bf16 %v270_v1, %v269_v0  ;;  %v272_v4 = vld [vmem:[%s228_s13 + $0x18] sm:$0xff]  ;;  %v2433_v5 = vld [vmem:[%s2420_s23] sm:$0xff]  ;;  %s1683_s25 = sshll.u32 %s257_s9, 4  ;;  %s2692_s12 = scalar_lea.hbm %s2742_s4, %s1829_s8  ;;  %s2694_s25 = int_to_ptr.vmem [resolvable:$true] %s1683_s25 }
  0x54   : > { %v2436_v6 = vld [vmem:[%s2420_s23 + $0x10] sm:$0xff]  ;;  %v1966_v7 = vpack.c.bf16 %v272_v4, %v271_v2  ;;  %1882 = vmatprep.mubr.msk.f32.mxu0 %vm279_vm0, %v2433_v5  ;;  %v273_v8 = vld [vmem:[%s228_s13 + $0x20] sm:$0xff]  ;;  %v274_v9 = vld [vmem:[%s228_s13 + $0x28] sm:$0xff]  ;;  %s1669_s19 = scalar_lea.sflag [#allocation4], %s2413_s10  ;;  %s2149_s14 = scalar_lea.vmem %s2694_s25, 1024 }
  0x55   : > { %1889 = vmatprep.mubr.msk.f32.mxu1 %vm279_vm0, %v2436_v6  ;;  %1963 = vmatprep.subr.bf16.mxu0 %v1962_v3  ;;  %v275_v10 = vld [vmem:[%s228_s13 + $0x30] sm:$0xff]  ;;  %v276_v11 = vld [vmem:[%s228_s13 + $0x38] sm:$0xff]  ;;  %v2443_v12 = vld [vmem:[%s2420_s23 + $0x8] sm:$0xff]  ;;  %v1970_v13 = vpack.c.bf16 %v274_v9, %v273_v8  ;;  %p2150_p13 = scmp.ne.s32.totalorder %s2694_s25, %s2149_s14  ;;  %p2752_p1 = scmp.ne.s32.totalorder %s2747_s27, 0 }
  0x56   : > { %1967 = vmatprep.subr.bf16.mxu1 %v1966_v7  ;;  %1965 = vmatpush3.bf16.msra.mxu0 %v1962_v3  ;;  %v1974_v14 = vpack.c.bf16 %v276_v11, %v275_v10  ;;  %v2446_v15 = vld [vmem:[%s2420_s23 + $0x18] sm:$0xff]  ;;  %v2449_v16 = vld [vmem:[%s2420_s23 + $0x20] sm:$0xff]  ;;  %v2454_v17 = vld [vmem:[%s2420_s23 + $0x30] sm:$0xff]  ;;  %s2225_s30 = smov [#allocation7]  }
  0x57   : > { %1969 = vmatpush3.bf16.msra.mxu1 %v1966_v7  ;;  %1971 = vmatprep.subr.bf16.mxu0 %v1970_v13  ;;  %v2459_v18 = vld [vmem:[%s2420_s23 + $0x28] sm:$0xff]  ;;  %v2464_v19 = vld [vmem:[%s2420_s23 + $0x38] sm:$0xff]  ;;  %p2151_p12 = pnand %p2150_p13, %p2752_p1  ;;  %s2153_s11 = sshll.u32 %s2225_s30, 4  ;;  %s2154_s11 = int_to_ptr.vmem [resolvable:$false] %s2153_s11 }
  0x58   : > { %1975 = vmatprep.subr.bf16.mxu1 %v1974_v14  ;;  %s2155_s23 = scalar_lea.vmem %s2154_s11, 2048  ;;  %p2156_p5 = scmp.lt.s32.totalorder %s2694_s25, %s2154_s11 }
  0x59   : > { %1883 = vmatmul.mubr.msk.f32.vlgmr.msra.gmra.mrb[0].mxu0 %vm279_vm0, %v2443_v12  ;;  %p2152_p10 = pneg %p2151_p12  ;;  %p2157_p7 = scmp.lt.s32.totalorder %s2155_s23, %s2149_s14 }
  0x5a   : > { %1890 = vmatmul.mubr.msk.f32.vlgmr.msra.gmra.mrb[0].mxu1 %vm279_vm0, %v2446_v15  ;;  %1973 = vmatpush3.bf16.msra.mxu0 %v1970_v13 }
  0x5b   : > { %1977 = vmatpush3.bf16.msra.mxu1 %v1974_v14  ;;  %1896 = vmatprep.mubr.msk.f32.mxu0 %vm279_vm0, %v2449_v16  ;;  %p2158_p9 = por %p2157_p7, %p2156_p5 }
  0x5c   : > { %1903 = vmatprep.mubr.msk.f32.mxu1 %vm279_vm0, %v2454_v17 }
  0x5d   : > { %1897 = vmatmul.mubr.msk.f32.vlgmr.msra.gmra.mrb[2].mxu0 %vm279_vm0, %v2459_v18  ;;  %p2159_p11 = pnand %p2158_p9, %p2152_p10 }
  0x5e   : > { %1904 = vmatmul.mubr.msk.f32.vlgmr.msra.gmra.mrb[2].mxu1 %vm279_vm0, %v2464_v19  ;;  %1910 = vmatprep.mubr.msk.f32.mxu0 %vm279_vm0, %v2433_v5 }
  0x5f   : > { %1917 = vmatprep.mubr.msk.f32.mxu1 %vm279_vm0, %v2436_v6 }
 0x12c   : > { %v2476_v20 = vpop.f32.mrb[0].mxu0 }
 0x12d   : > { %v637_v21 = vmul.f32 %v2476_v20, %v2476_v20  ;;  %v2480_v22 = vpop.f32.mrb[0].mxu1  ;;  %v2482_v23 = vpop.f32.mrb[1].mxu0 }
 0x12e   : > { %v639_v24 = vmul.f32 %v2480_v22, %v2480_v22  ;;  %v604_v25 = vadd.f32 %v2476_v20, %v2482_v23  ;;  %v636_v26 = vmul.f32 %v2482_v23, %v2482_v23  ;;  %v2490_v27 = vpop.f32.mrb[1].mxu1 }
 0x12f   : > { %v611_v28 = vadd.f32 %v2480_v22, %v2490_v27  ;;  %v638_v29 = vmul.f32 %v2490_v27, %v2490_v27 }
 0x130   : > { %v605_v30 = vrot.slane %v604_v25, 4  ;;  %v644_v31 = vadd.f32 %v637_v21, %v636_v26  ;;  %v2496_v32 = vpop.f32.mrb[2].mxu0 }
 0x131   : > { %v612_v33 = vrot.slane %v611_v28, 4  ;;  %v651_v34 = vadd.f32 %v639_v24, %v638_v29  ;;  %v641_v35 = vmul.f32 %v2496_v32, %v2496_v32  ;;  %v2500_v36 = vpop.f32.mrb[2].mxu1  ;;  %v2502_v37 = vpop.f32.mrb[3].mxu0 }
 0x132   : > { %v606_v38 = vadd.f32 %v605_v30, %v604_v25  ;;  %v645_v39 = vrot.slane %v644_v31, 4  ;;  %v643_v40 = vmul.f32 %v2500_v36, %v2500_v36  ;;  %v618_v41 = vadd.f32 %v2496_v32, %v2502_v37  ;;  %v2508_v42 = vpop.f32.mrb[3].mxu1 }
 0x133   : > { %v613_v43 = vadd.f32 %v612_v33, %v611_v28  ;;  %v652_v44 = vrot.slane %v651_v34, 4  ;;  %v640_v45 = vmul.f32 %v2502_v37, %v2502_v37  ;;  %v625_v46 = vadd.f32 %v2500_v36, %v2508_v42 }
 0x134   : > { %v607_v47 = vrot.slane %v606_v38, 2  ;;  %v646_v48 = vadd.f32 %v645_v39, %v644_v31  ;;  %v619_v49 = vrot.slane %v618_v41, 4  ;;  %v642_v50 = vmul.f32 %v2508_v42, %v2508_v42 }
 0x135   : > { %v614_v51 = vrot.slane %v613_v43, 2  ;;  %v653_v52 = vadd.f32 %v652_v44, %v651_v34  ;;  %v658_v53 = vadd.f32 %v641_v35, %v640_v45  ;;  %v626_v54 = vrot.slane %v625_v46, 4 }
 0x136   : > { %v608_v55 = vadd.f32 %v607_v47, %v606_v38  ;;  %v647_v56 = vrot.slane %v646_v48, 2  ;;  %v620_v57 = vadd.f32 %v619_v49, %v618_v41  ;;  %v665_v58 = vadd.f32 %v643_v40, %v642_v50 }
 0x137   : > { %v615_v59 = vadd.f32 %v614_v51, %v613_v43  ;;  %v654_v60 = vrot.slane %v653_v52, 2  ;;  %v659_v61 = vrot.slane %v658_v53, 4  ;;  %v627_v62 = vadd.f32 %v626_v54, %v625_v46 }
 0x138   : > { %v609_v63 = vrot.slane %v608_v55, 1  ;;  %v648_v0 = vadd.f32 %v647_v56, %v646_v48  ;;  %v621_v1 = vrot.slane %v620_v57, 2  ;;  %v666_v2 = vrot.slane %v665_v58, 4 }
 0x139   : > { %v616_v3 = vrot.slane %v615_v59, 1  ;;  %v655_v4 = vadd.f32 %v654_v60, %v653_v52  ;;  %v660_v7 = vadd.f32 %v659_v61, %v658_v53  ;;  %v628_v8 = vrot.slane %v627_v62, 2 }
 0x13a   : > { %v610_v9 = vadd.f32 %v609_v63, %v608_v55  ;;  %v649_v10 = vrot.slane %v648_v0, 1  ;;  %v622_v11 = vadd.f32 %v621_v1, %v620_v57  ;;  %v667_v13 = vadd.f32 %v666_v2, %v665_v58 }
 0x13b   : > { %v617_v14 = vadd.f32 %v616_v3, %v615_v59  ;;  %v656_v21 = vrot.slane %v655_v4, 1  ;;  %v661_v24 = vrot.slane %v660_v7, 2  ;;  %v629_v25 = vadd.f32 %v628_v8, %v627_v62  ;;  %v2521_v8 = vld [vmem:[%s2740_s2] sm:$0x7] }
 0x13c   : > { %v632_v26 = vmul.f32 0.0625, %v610_v9  ;;  %v650_v28 = vadd.f32 %v649_v10, %v648_v0  ;;  %v623_v29 = vrot.slane %v622_v11, 1  ;;  %v668_v30 = vrot.slane %v667_v13, 2 }
 0x13d   : > { %v633_v31 = vmul.f32 0.0625, %v617_v14  ;;  %v657_v33 = vadd.f32 %v656_v21, %v655_v4  ;;  %v662_v34 = vadd.f32 %v661_v24, %v660_v7  ;;  %v630_v35 = vrot.slane %v629_v25, 1  ;;  %v2528_v14 = vld [vmem:[%s2741_s3] sm:$0x7] }
 0x13e   : > { %v672_v38 = vmul.f32 0.0625, %v650_v28  ;;  %v676_v39 = vmul.f32 %v632_v26, %v632_v26  ;;  %v624_v40 = vadd.f32 %v623_v29, %v622_v11  ;;  %v669_v41 = vadd.f32 %v668_v30, %v667_v13 }
 0x13f   : > { %v673_v43 = vmul.f32 0.0625, %v657_v33  ;;  %v677_v44 = vmul.f32 %v633_v31, %v633_v31  ;;  %v663_v45 = vrot.slane %v662_v34, 1  ;;  %v631_v46 = vadd.f32 %v630_v35, %v629_v25 }
 0x140   : > { %v680_v47 = vsub.f32 %v672_v38, %v676_v39  ;;  %v634_v48 = vmul.f32 0.0625, %v624_v40  ;;  %v670_v49 = vrot.slane %v669_v41, 1  ;;  %v708_v0 = vlaneseq }
 0x141   : > { %v681_v50 = vsub.f32 %v673_v43, %v677_v44  ;;  %v664_v51 = vadd.f32 %v663_v45, %v662_v34  ;;  %v635_v52 = vmul.f32 0.0625, %v631_v46 }
 0x142   : > { %v684_v53 = vmax.f32 %v680_v47, 0.0  ;;  %v678_v54 = vmul.f32 %v634_v48, %v634_v48  ;;  %v671_v55 = vadd.f32 %v670_v49, %v669_v41  ;;  %v2516_v7 = vshrl.u32 %v708_v0, 7 }
 0x143   : > { %v685_v56 = vmax.f32 %v681_v50, 0.0  ;;  %v674_v57 = vmul.f32 0.0625, %v664_v51  ;;  %v679_v58 = vmul.f32 %v635_v52, %v635_v52 }
 0x144   : > { %v688_v59 = vadd.f32 1e-05, %v684_v53  ;;  %v675_v60 = vmul.f32 0.0625, %v671_v55  ;;  %v710_v9 = vsub.s32 0, %v2516_v7 }
 0x145   : > { %v689_v61 = vadd.f32 1e-05, %v685_v56  ;;  %v682_v62 = vsub.f32 %v674_v57, %v678_v54 }
 0x146   : > { %2065 = vrsqrt.f32 %v688_v59  ;;  %v683_v63 = vsub.f32 %v675_v60, %v679_v58 }
 0x147   : > { %2067 = vrsqrt.f32 %v689_v61  ;;  %v686_v1 = vmax.f32 %v682_v62, 0.0 }
 0x148   : > { %v687_v2 = vmax.f32 %v683_v63, 0.0 }
 0x149   : > { %v690_v3 = vadd.f32 1e-05, %v686_v1 }
 0x14a   : > { %v691_v4 = vadd.f32 1e-05, %v687_v2 }
 0x14b   : > { %2069 = vrsqrt.f32 %v690_v3 }
 0x14c   : > { %2071 = vrsqrt.f32 %v691_v4 }
 0x150   : > { %v2066_v10 = vpop.eup %2065 }
 0x151   : > { %v2068_v11 = vpop.eup %2067  ;;  %v696_v13 = vmul.f32 %v2066_v10, %v2521_v8 }
 0x152   : > { %v697_v21 = vmul.f32 %v2068_v11, %v2521_v8 }
 0x153   : > { %v700_v24 = vmul.f32 %v696_v13, %v632_v26  ;;  %v711_v25 = vrot.slane %v696_v13, %v710_v9 }
 0x154   : > { %v701_v28 = vmul.f32 %v697_v21, %v633_v31  ;;  %v715_v29 = vrot.slane %v697_v21, %v710_v9 }
 0x155   : > { %v2070_v30 = vpop.eup %2069  ;;  %v704_v33 = vsub.f32 %v2528_v14, %v700_v24  ;;  %v724_v34 = vmul.f32 %v711_v25, %v2482_v23  ;;  %v725_v35 = vmul.f32 %v2476_v20, %v711_v25 }
 0x156   : > { %v2072_v38 = vpop.eup %2071  ;;  %v705_v39 = vsub.f32 %v2528_v14, %v701_v28  ;;  %v726_v40 = vmul.f32 %v715_v29, %v2490_v27  ;;  %v727_v41 = vmul.f32 %v2480_v22, %v715_v29  ;;  %v698_v43 = vmul.f32 %v2070_v30, %v2521_v8 }
 0x157   : > { %v735_v26 = vrot.slane %v704_v33, %v710_v9  ;;  %v699_v31 = vmul.f32 %v2072_v38, %v2521_v8 }
 0x158   : > { %v739_v44 = vrot.slane %v705_v39, %v710_v9  ;;  %v702_v45 = vmul.f32 %v698_v43, %v634_v48  ;;  %v719_v46 = vrot.slane %v698_v43, %v710_v9 }
 0x159   : > { %v748_v47 = vadd.f32 %v735_v26, %v724_v34  ;;  %v703_v49 = vmul.f32 %v699_v31, %v635_v52  ;;  %v723_v23 = vrot.slane %v699_v31, %v710_v9  ;;  %v749_v50 = vadd.f32 %v735_v26, %v725_v35 }
 0x15a   : > { %v750_v20 = vadd.f32 %v739_v44, %v726_v40  ;;  %v706_v51 = vsub.f32 %v2528_v14, %v702_v45  ;;  %v728_v53 = vmul.f32 %v719_v46, %v2502_v37  ;;  %v729_v27 = vmul.f32 %v2496_v32, %v719_v46 }
 0x15b   : > { %v707_v22 = vsub.f32 %v2528_v14, %v703_v49  ;;  %v730_v54 = vmul.f32 %v723_v23, %v2508_v42  ;;  %v731_v55 = vmul.f32 %v2500_v36, %v723_v23  ;;  %v1978_v56 = vpack.c.bf16 %v749_v50, %v748_v47 }
 0x15c   : > { %v743_v48 = vrot.slane %v706_v51, %v710_v9  ;;  %v751_v57 = vadd.f32 %v739_v44, %v727_v41 }
 0x15d   : > { %v747_v58 = vrot.slane %v707_v22, %v710_v9  ;;  %1979 = vmatprep.subr.bf16.mxu0 %v1978_v56 }
 0x15e   : > { %v752_v52 = vadd.f32 %v743_v48, %v728_v53  ;;  %v1982_v59 = vpack.c.bf16 %v751_v57, %v750_v20  ;;  %1981 = vmatpush3.bf16.msra.mxu0 %v1978_v56  ;;  %v753_v60 = vadd.f32 %v743_v48, %v729_v27 }
 0x15f   : > { %v754_v61 = vadd.f32 %v747_v58, %v730_v54  ;;  %v755_v62 = vadd.f32 %v747_v58, %v731_v55 }
 0x160   : > { %1983 = vmatprep.subr.bf16.mxu1 %v1982_v59  ;;  %v1986_v37 = vpack.c.bf16 %v753_v60, %v752_v52 }
 0x161   : > { %1985 = vmatpush3.bf16.msra.mxu1 %v1982_v59  ;;  %1911 = vmatmul.mubr.msk.f32.vlgmr.msra.gmra.mrb[4].mxu0 %vm279_vm0, %v2443_v12  ;;  %v1990_v32 = vpack.c.bf16 %v755_v62, %v754_v61 }
 0x162   : > { %1987 = vmatprep.subr.bf16.mxu0 %v1986_v37  ;;  %1924 = vmatprep.mubr.msk.f32.mxu0 %vm279_vm0, %v2449_v16 }
 0x163   : > { %1991 = vmatprep.subr.bf16.mxu1 %v1990_v32  ;;  %1989 = vmatpush3.bf16.msra.mxu0 %v1986_v37 }
 0x164   : > { %1918 = vmatmul.mubr.msk.f32.vlgmr.msra.gmra.mrb[4].mxu1 %vm279_vm0, %v2446_v15 }
 0x165   : > { %1993 = vmatpush3.bf16.msra.mxu1 %v1990_v32  ;;  %1931 = vmatprep.mubr.msk.f32.mxu1 %vm279_vm0, %v2454_v17 }
 0x166   : > { %1925 = vmatmul.mubr.msk.f32.vlgmr.msra.gmra.mrb[6].mxu0 %vm279_vm0, %v2459_v18 }
 0x167   : > { %1938 = vmatprep.mubr.msk.f32.mxu0 %vm279_vm0, %v2433_v5 }
 0x168   : > { %1932 = vmatmul.mubr.msk.f32.vlgmr.msra.gmra.mrb[6].mxu1 %vm279_vm0, %v2464_v19 }
 0x169   : > { %1945 = vmatprep.mubr.msk.f32.mxu1 %vm279_vm0, %v2436_v6 }
 0x234   : > { %v2561_v36 = vpop.f32.mrb[4].mxu0 }
 0x235   : > { %v1089_v42 = vmul.f32 %v2561_v36, %v2561_v36  ;;  %v2565_v63 = vpop.f32.mrb[5].mxu0 }
 0x236   : > { %v1056_v0 = vadd.f32 %v2561_v36, %v2565_v63  ;;  %v1088_v1 = vmul.f32 %v2565_v63, %v2565_v63 }
 0x237   : > { %v2571_v5 = vpop.f32.mrb[4].mxu1 }
 0x238   : > { %v1091_v2 = vmul.f32 %v2571_v5, %v2571_v5  ;;  %v1057_v3 = vrot.slane %v1056_v0, 4  ;;  %v1096_v6 = vadd.f32 %v1089_v42, %v1088_v1  ;;  %v2575_v4 = vpop.f32.mrb[5].mxu1 }
 0x239   : > { %v1063_v9 = vadd.f32 %v2571_v5, %v2575_v4  ;;  %v1090_v10 = vmul.f32 %v2575_v4, %v2575_v4  ;;  %v2581_v11 = vpop.f32.mrb[6].mxu0 }
 0x23a   : > { %v1058_v13 = vadd.f32 %v1057_v3, %v1056_v0  ;;  %v1097_v21 = vrot.slane %v1096_v6, 4  ;;  %v1093_v24 = vmul.f32 %v2581_v11, %v2581_v11  ;;  %v2585_v25 = vpop.f32.mrb[7].mxu0 }
 0x23b   : > { %v1064_v28 = vrot.slane %v1063_v9, 4  ;;  %v1103_v29 = vadd.f32 %v1091_v2, %v1090_v10  ;;  %v2587_v30 = vpop.f32.mrb[6].mxu1  ;;  %v1070_v33 = vadd.f32 %v2581_v11, %v2585_v25  ;;  %v1092_v34 = vmul.f32 %v2585_v25, %v2585_v25 }
 0x23c   : > { %v1059_v35 = vrot.slane %v1058_v13, 2  ;;  %v1098_v38 = vadd.f32 %v1097_v21, %v1096_v6  ;;  %v1095_v39 = vmul.f32 %v2587_v30, %v2587_v30  ;;  %v2595_v40 = vpop.f32.mrb[7].mxu1 }
 0x23d   : > { %v1065_v41 = vadd.f32 %v1064_v28, %v1063_v9  ;;  %v1104_v43 = vrot.slane %v1103_v29, 4  ;;  %v1071_v26 = vrot.slane %v1070_v33, 4  ;;  %v1110_v31 = vadd.f32 %v1093_v24, %v1092_v34 }
 0x23e   : > { %v1060_v44 = vadd.f32 %v1059_v35, %v1058_v13  ;;  %v1099_v45 = vrot.slane %v1098_v38, 2  ;;  %v1077_v46 = vadd.f32 %v2587_v30, %v2595_v40  ;;  %v1094_v47 = vmul.f32 %v2595_v40, %v2595_v40 }
 0x23f   : > { %v1066_v49 = vrot.slane %v1065_v41, 2  ;;  %v1105_v23 = vadd.f32 %v1104_v43, %v1103_v29  ;;  %v1072_v50 = vadd.f32 %v1071_v26, %v1070_v33  ;;  %v1111_v20 = vrot.slane %v1110_v31, 4 }
 0x240   : > { %v1061_v51 = vrot.slane %v1060_v44, 1  ;;  %v1100_v53 = vadd.f32 %v1099_v45, %v1098_v38  ;;  %v1078_v27 = vrot.slane %v1077_v46, 4  ;;  %v1117_v22 = vadd.f32 %v1095_v39, %v1094_v47 }
 0x241   : > { %v1067_v54 = vadd.f32 %v1066_v49, %v1065_v41  ;;  %v1106_v55 = vrot.slane %v1105_v23, 2  ;;  %v1073_v56 = vrot.slane %v1072_v50, 2  ;;  %v1112_v48 = vadd.f32 %v1111_v20, %v1110_v31 }
 0x242   : > { %v1062_v57 = vadd.f32 %v1061_v51, %v1060_v44  ;;  %v1101_v58 = vrot.slane %v1100_v53, 1  ;;  %v1079_v52 = vadd.f32 %v1078_v27, %v1077_v46  ;;  %v1118_v59 = vrot.slane %v1117_v22, 4 }
 0x243   : > { %v1068_v60 = vrot.slane %v1067_v54, 1  ;;  %v1107_v61 = vadd.f32 %v1106_v55, %v1105_v23  ;;  %v1074_v62 = vadd.f32 %v1073_v56, %v1072_v50  ;;  %v1113_v37 = vrot.slane %v1112_v48, 2 }
 0x244   : > { %v1084_v32 = vmul.f32 0.0625, %v1062_v57  ;;  %v1102_v42 = vadd.f32 %v1101_v58, %v1100_v53  ;;  %v1080_v0 = vrot.slane %v1079_v52, 2  ;;  %v1119_v1 = vadd.f32 %v1118_v59, %v1117_v22 }
 0x245   : > { %v1069_v2 = vadd.f32 %v1068_v60, %v1067_v54  ;;  %v1108_v3 = vrot.slane %v1107_v61, 1  ;;  %v1075_v6 = vrot.slane %v1074_v62, 1  ;;  %v1114_v9 = vadd.f32 %v1113_v37, %v1112_v48 }
 0x246   : > { %v1124_v10 = vmul.f32 0.0625, %v1102_v42  ;;  %v1128_v13 = vmul.f32 %v1084_v32, %v1084_v32  ;;  %v1081_v21 = vadd.f32 %v1080_v0, %v1079_v52  ;;  %v1120_v24 = vrot.slane %v1119_v1, 2 }
 0x247   : > { %v1085_v28 = vmul.f32 0.0625, %v1069_v2  ;;  %v1109_v29 = vadd.f32 %v1108_v3, %v1107_v61  ;;  %v1076_v33 = vadd.f32 %v1075_v6, %v1074_v62  ;;  %v1115_v34 = vrot.slane %v1114_v9, 1 }
 0x248   : > { %v1132_v35 = vsub.f32 %v1124_v10, %v1128_v13  ;;  %v1082_v38 = vrot.slane %v1081_v21, 1  ;;  %v1121_v39 = vadd.f32 %v1120_v24, %v1119_v1  ;;  %v1162_v59 = vsub.s32 1, %v2516_v7 }
 0x249   : > { %v1125_v41 = vmul.f32 0.0625, %v1109_v29  ;;  %v1129_v43 = vmul.f32 %v1085_v28, %v1085_v28  ;;  %v1086_v26 = vmul.f32 0.0625, %v1076_v33  ;;  %v1116_v31 = vadd.f32 %v1115_v34, %v1114_v9 }
 0x24a   : > { %v1136_v44 = vmax.f32 %v1132_v35, 0.0  ;;  %v1083_v45 = vadd.f32 %v1082_v38, %v1081_v21  ;;  %v1122_v46 = vrot.slane %v1121_v39, 1 }
 0x24b   : > { %v1133_v47 = vsub.f32 %v1125_v41, %v1129_v43  ;;  %v1126_v49 = vmul.f32 0.0625, %v1116_v31  ;;  %v1130_v23 = vmul.f32 %v1086_v26, %v1086_v26 }
 0x24c   : > { %v1140_v50 = vadd.f32 1e-05, %v1136_v44  ;;  %v1087_v20 = vmul.f32 0.0625, %v1083_v45  ;;  %v1123_v51 = vadd.f32 %v1122_v46, %v1121_v39 }
 0x24d   : > { %v1137_v53 = vmax.f32 %v1133_v47, 0.0  ;;  %v1134_v27 = vsub.f32 %v1126_v49, %v1130_v23 }
 0x24e   : > { %2073 = vrsqrt.f32 %v1140_v50  ;;  %v1127_v22 = vmul.f32 0.0625, %v1123_v51  ;;  %v1131_v54 = vmul.f32 %v1087_v20, %v1087_v20 }
 0x24f   : > { %v1141_v55 = vadd.f32 1e-05, %v1137_v53  ;;  %v1138_v56 = vmax.f32 %v1134_v27, 0.0 }
 0x250   : > { %v1135_v48 = vsub.f32 %v1127_v22, %v1131_v54 }
 0x251   : > { %2075 = vrsqrt.f32 %v1141_v55  ;;  %v1142_v57 = vadd.f32 1e-05, %v1138_v56 }
 0x252   : > { %v1139_v58 = vmax.f32 %v1135_v48, 0.0 }
 0x253   : > { %2077 = vrsqrt.f32 %v1142_v57 }
 0x254   : > { %v1143_v52 = vadd.f32 1e-05, %v1139_v58 }
 0x256   : > { %2079 = vrsqrt.f32 %v1143_v52 }
 0x258   : > { %v2074_v60 = vpop.eup %2073 }
 0x259   : > { %v1148_v61 = vmul.f32 %v2074_v60, %v2521_v8 }
 0x25b   : > { %v2076_v62 = vpop.eup %2075  ;;  %v1152_v37 = vmul.f32 %v1148_v61, %v1084_v32  ;;  %v1163_v42 = vrot.slane %v1148_v61, %v1162_v59 }
 0x25c   : > { %v1149_v0 = vmul.f32 %v2076_v62, %v2521_v8 }
 0x25d   : > { %v2078_v1 = vpop.eup %2077  ;;  %v1156_v2 = vsub.f32 %v2528_v14, %v1152_v37  ;;  %v1176_v3 = vmul.f32 %v1163_v42, %v2565_v63  ;;  %v1177_v6 = vmul.f32 %v2561_v36, %v1163_v42 }
 0x25e   : > { %v1153_v9 = vmul.f32 %v1149_v0, %v1085_v28  ;;  %v1167_v10 = vrot.slane %v1149_v0, %v1162_v59  ;;  %v1150_v13 = vmul.f32 %v2078_v1, %v2521_v8 }
 0x25f   : > { %v1187_v21 = vrot.slane %v1156_v2, %v1162_v59 }
 0x260   : > { %v2080_v24 = vpop.eup %2079  ;;  %v1157_v29 = vsub.f32 %v2528_v14, %v1153_v9  ;;  %v1178_v32 = vmul.f32 %v1167_v10, %v2575_v4  ;;  %v1179_v33 = vmul.f32 %v2571_v5, %v1167_v10  ;;  %v1154_v34 = vmul.f32 %v1150_v13, %v1086_v26 }
 0x261   : > { %v1200_v35 = vadd.f32 %v1187_v21, %v1176_v3  ;;  %v1171_v38 = vrot.slane %v1150_v13, %v1162_v59  ;;  %v1151_v39 = vmul.f32 %v2080_v24, %v2521_v8  ;;  %v1201_v63 = vadd.f32 %v1187_v21, %v1177_v6 }
 0x262   : > { %v1191_v41 = vrot.slane %v1157_v29, %v1162_v59  ;;  %v1158_v36 = vsub.f32 %v2528_v14, %v1154_v34 }
 0x263   : > { %v1180_v28 = vmul.f32 %v1171_v38, %v2585_v25  ;;  %v1181_v43 = vmul.f32 %v2581_v11, %v1171_v38  ;;  %v1155_v31 = vmul.f32 %v1151_v39, %v1087_v20  ;;  %v1175_v44 = vrot.slane %v1151_v39, %v1162_v59 }
 0x264   : > { %v1202_v45 = vadd.f32 %v1191_v41, %v1178_v32  ;;  %v1195_v46 = vrot.slane %v1158_v36, %v1162_v59  ;;  %v1994_v4 = vpack.c.bf16 %v1201_v63, %v1200_v35  ;;  %v1203_v47 = vadd.f32 %v1191_v41, %v1179_v33 }
 0x265   : > { %v1159_v5 = vsub.f32 %v2528_v14, %v1155_v31  ;;  %v1182_v26 = vmul.f32 %v1175_v44, %v2595_v40  ;;  %v1183_v49 = vmul.f32 %v2587_v30, %v1175_v44 }
 0x266   : > { %v1204_v23 = vadd.f32 %v1195_v46, %v1180_v28  ;;  %1995 = vmatprep.subr.bf16.mxu0 %v1994_v4  ;;  %v1998_v50 = vpack.c.bf16 %v1203_v47, %v1202_v45  ;;  %v1205_v51 = vadd.f32 %v1195_v46, %v1181_v43 }
 0x267   : > { %v1199_v53 = vrot.slane %v1159_v5, %v1162_v59  ;;  %1997 = vmatpush3.bf16.msra.mxu0 %v1994_v4 }
 0x268   : > { %1999 = vmatprep.subr.bf16.mxu1 %v1998_v50  ;;  %v2002_v11 = vpack.c.bf16 %v1205_v51, %v1204_v23 }
 0x269   : > { %v1206_v25 = vadd.f32 %v1199_v53, %v1182_v26  ;;  %2001 = vmatpush3.bf16.msra.mxu1 %v1998_v50  ;;  %v1207_v20 = vadd.f32 %v1199_v53, %v1183_v49 }
 0x26a   : > { %1939 = vmatmul.mubr.msk.f32.vlgmr.msra.gmra.mrb[8].mxu0 %vm279_vm0, %v2443_v12  ;;  %2003 = vmatprep.subr.bf16.mxu0 %v2002_v11 }
 0x26b   : > { %v2006_v27 = vpack.c.bf16 %v1207_v20, %v1206_v25  ;;  %2005 = vmatpush3.bf16.msra.mxu0 %v2002_v11  ;;  %1952 = vmatprep.mubr.msk.f32.mxu0 %vm279_vm0, %v2449_v16 }
 0x26c   : > { %1946 = vmatmul.mubr.msk.f32.vlgmr.msra.gmra.mrb[8].mxu1 %vm279_vm0, %v2446_v15 }
 0x26d   : > { %2007 = vmatprep.subr.bf16.mxu1 %v2006_v27  ;;  %1959 = vmatprep.mubr.msk.f32.mxu1 %vm279_vm0, %v2454_v17 }
 0x26e   : > { %2009 = vmatpush3.bf16.msra.mxu1 %v2006_v27  ;;  %1953 = vmatmul.mubr.msk.f32.vlgmr.msra.gmra.mrb[10].mxu0 %vm279_vm0, %v2459_v18 }
 0x271   : > { %1960 = vmatmul.mubr.msk.f32.vlgmr.msra.gmra.mrb[10].mxu1 %vm279_vm0, %v2464_v19 }
 0x33d   : > { %v2630_v12 = vpop.f32.mrb[8].mxu0 }
 0x33e   : > { %v1541_v30 = vmul.f32 %v2630_v12, %v2630_v12  ;;  %v2634_v16 = vpop.f32.mrb[9].mxu0 }
 0x33f   : > { %v2636_v40 = vpop.f32.mrb[8].mxu1  ;;  %v1508_v15 = vadd.f32 %v2630_v12, %v2634_v16  ;;  %v1540_v17 = vmul.f32 %v2634_v16, %v2634_v16 }
 0x340   : > { %v1543_v18 = vmul.f32 %v2636_v40, %v2636_v40  ;;  %v2644_v22 = vpop.f32.mrb[9].mxu1 }
 0x341   : > { %v1509_v19 = vrot.slane %v1508_v15, 4  ;;  %v1548_v54 = vadd.f32 %v1541_v30, %v1540_v17  ;;  %v1515_v55 = vadd.f32 %v2636_v40, %v2644_v22  ;;  %v1542_v56 = vmul.f32 %v2644_v22, %v2644_v22  ;;  %v2650_v48 = vpop.f32.mrb[10].mxu0 }
 0x342   : > { %v1545_v57 = vmul.f32 %v2650_v48, %v2650_v48  ;;  %v2654_v58 = vpop.f32.mrb[11].mxu0 }
 0x343   : > { %v1510_v52 = vadd.f32 %v1509_v19, %v1508_v15  ;;  %v1549_v59 = vrot.slane %v1548_v54, 4  ;;  %v1516_v60 = vrot.slane %v1515_v55, 4  ;;  %v1555_v61 = vadd.f32 %v1543_v18, %v1542_v56 }
 0x344   : > { %v2656_v62 = vpop.f32.mrb[10].mxu1  ;;  %v1522_v37 = vadd.f32 %v2650_v48, %v2654_v58  ;;  %v1544_v42 = vmul.f32 %v2654_v58, %v2654_v58 }
 0x345   : > { %v1511_v0 = vrot.slane %v1510_v52, 2  ;;  %v1550_v1 = vadd.f32 %v1549_v59, %v1548_v54  ;;  %v1517_v2 = vadd.f32 %v1516_v60, %v1515_v55  ;;  %v1556_v3 = vrot.slane %v1555_v61, 4  ;;  %v2662_v6 = vpop.f32.mrb[11].mxu1 }
 0x346   : > { %v1547_v9 = vmul.f32 %v2656_v62, %v2656_v62  ;;  %v1523_v10 = vrot.slane %v1522_v37, 4  ;;  %v1562_v13 = vadd.f32 %v1545_v57, %v1544_v42  ;;  %v1529_v21 = vadd.f32 %v2656_v62, %v2662_v6 }
 0x347   : > { %v1512_v24 = vadd.f32 %v1511_v0, %v1510_v52  ;;  %v1551_v29 = vrot.slane %v1550_v1, 2  ;;  %v1518_v32 = vrot.slane %v1517_v2, 2  ;;  %v1557_v33 = vadd.f32 %v1556_v3, %v1555_v61 }
 0x348   : > { %v1524_v34 = vadd.f32 %v1523_v10, %v1522_v37  ;;  %v1563_v35 = vrot.slane %v1562_v13, 4  ;;  %v1530_v38 = vrot.slane %v1529_v21, 4  ;;  %v1546_v39 = vmul.f32 %v2662_v6, %v2662_v6 }
 0x349   : > { %v1513_v63 = vrot.slane %v1512_v24, 1  ;;  %v1552_v41 = vadd.f32 %v1551_v29, %v1550_v1  ;;  %v1519_v36 = vadd.f32 %v1518_v32, %v1517_v2  ;;  %v1558_v28 = vrot.slane %v1557_v33, 2 }
 0x34a   : > { %v1525_v43 = vrot.slane %v1524_v34, 2  ;;  %v1564_v31 = vadd.f32 %v1563_v35, %v1562_v13  ;;  %v1531_v44 = vadd.f32 %v1530_v38, %v1529_v21  ;;  %v1569_v45 = vadd.f32 %v1547_v9, %v1546_v39 }
 0x34b   : > { %v1514_v46 = vadd.f32 %v1513_v63, %v1512_v24  ;;  %v1553_v4 = vrot.slane %v1552_v41, 1  ;;  %v1520_v47 = vrot.slane %v1519_v36, 1  ;;  %v1559_v5 = vadd.f32 %v1558_v28, %v1557_v33 }
 0x34c   : > { %v1526_v26 = vadd.f32 %v1525_v43, %v1524_v34  ;;  %v1565_v49 = vrot.slane %v1564_v31, 2  ;;  %v1532_v23 = vrot.slane %v1531_v44, 2  ;;  %v1570_v50 = vrot.slane %v1569_v45, 4 }
 0x34d   : > { %v1536_v51 = vmul.f32 0.0625, %v1514_v46  ;;  %v1554_v53 = vadd.f32 %v1553_v4, %v1552_v41  ;;  %v1521_v11 = vadd.f32 %v1520_v47, %v1519_v36  ;;  %v1560_v25 = vrot.slane %v1559_v5, 1 }
 0x34e   : > { %v1527_v20 = vrot.slane %v1526_v26, 1  ;;  %v1566_v27 = vadd.f32 %v1565_v49, %v1564_v31  ;;  %v1533_v30 = vadd.f32 %v1532_v23, %v1531_v44  ;;  %v1571_v15 = vadd.f32 %v1570_v50, %v1569_v45 }
 0x34f   : > { %v1576_v17 = vmul.f32 0.0625, %v1554_v53  ;;  %v1580_v18 = vmul.f32 %v1536_v51, %v1536_v51  ;;  %v1537_v19 = vmul.f32 0.0625, %v1521_v11  ;;  %v1561_v54 = vadd.f32 %v1560_v25, %v1559_v5 }
 0x350   : > { %v1528_v55 = vadd.f32 %v1527_v20, %v1526_v26  ;;  %v1567_v56 = vrot.slane %v1566_v27, 1  ;;  %v1534_v57 = vrot.slane %v1533_v30, 1  ;;  %v1572_v52 = vrot.slane %v1571_v15, 2 }
 0x351   : > { %v1584_v59 = vsub.f32 %v1576_v17, %v1580_v18  ;;  %v1577_v60 = vmul.f32 0.0625, %v1561_v54  ;;  %v1581_v61 = vmul.f32 %v1537_v19, %v1537_v19  ;;  %v1614_v43 = vsub.s32 2, %v2516_v7 }
 0x352   : > { %v1538_v37 = vmul.f32 0.0625, %v1528_v55  ;;  %v1568_v42 = vadd.f32 %v1567_v56, %v1566_v27  ;;  %v1535_v0 = vadd.f32 %v1534_v57, %v1533_v30  ;;  %v1573_v1 = vadd.f32 %v1572_v52, %v1571_v15 }
 0x353   : > { %v1588_v2 = vmax.f32 %v1584_v59, 0.0  ;;  %v1585_v3 = vsub.f32 %v1577_v60, %v1581_v61 }
 0x354   : > { %v1578_v9 = vmul.f32 0.0625, %v1568_v42  ;;  %v1582_v10 = vmul.f32 %v1538_v37, %v1538_v37  ;;  %v1539_v13 = vmul.f32 0.0625, %v1535_v0  ;;  %v1574_v21 = vrot.slane %v1573_v1, 1 }
 0x355   : > { %v1592_v24 = vadd.f32 1e-05, %v1588_v2  ;;  %v1589_v29 = vmax.f32 %v1585_v3, 0.0 }
 0x356   : > { %v1586_v32 = vsub.f32 %v1578_v9, %v1582_v10  ;;  %v1575_v33 = vadd.f32 %v1574_v21, %v1573_v1  ;;  %v1583_v34 = vmul.f32 %v1539_v13, %v1539_v13 }
 0x357   : > { %2081 = vrsqrt.f32 %v1592_v24  ;;  %v1593_v35 = vadd.f32 1e-05, %v1589_v29 }
 0x358   : > { %v1590_v38 = vmax.f32 %v1586_v32, 0.0  ;;  %v1579_v39 = vmul.f32 0.0625, %v1575_v33 }
 0x359   : > { %2083 = vrsqrt.f32 %v1593_v35 }
 0x35a   : > { %v1594_v63 = vadd.f32 1e-05, %v1590_v38  ;;  %v1587_v41 = vsub.f32 %v1579_v39, %v1583_v34 }
 0x35c   : > { %2085 = vrsqrt.f32 %v1594_v63  ;;  %v1591_v36 = vmax.f32 %v1587_v41, 0.0 }
 0x35e   : > { %v1595_v28 = vadd.f32 1e-05, %v1591_v36 }
 0x360   : > { %2087 = vrsqrt.f32 %v1595_v28 }
 0x361   : > { %v2082_v31 = vpop.eup %2081 }
 0x362   : > { %v1600_v44 = vmul.f32 %v2082_v31, %v2521_v8 }
 0x363   : > { %v2084_v45 = vpop.eup %2083 }
 0x364   : > { %v1604_v46 = vmul.f32 %v1600_v44, %v1536_v51  ;;  %v1615_v4 = vrot.slane %v1600_v44, %v1614_v43  ;;  %v1601_v47 = vmul.f32 %v2084_v45, %v2521_v8 }
 0x366   : > { %v2086_v5 = vpop.eup %2085  ;;  %v1608_v26 = vsub.f32 %v2528_v14, %v1604_v46  ;;  %v1628_v49 = vmul.f32 %v1615_v4, %v2634_v16  ;;  %v1629_v23 = vmul.f32 %v2630_v12, %v1615_v4  ;;  %v1605_v50 = vmul.f32 %v1601_v47, %v1537_v19 }
 0x367   : > { %v1619_v53 = vrot.slane %v1601_v47, %v1614_v43  ;;  %v1602_v7 = vmul.f32 %v2086_v5, %v2521_v8 }
 0x368   : > { %v1639_v11 = vrot.slane %v1608_v26, %v1614_v43  ;;  %v1609_v25 = vsub.f32 %v2528_v14, %v1605_v50 }
 0x369   : > { %v1630_v51 = vmul.f32 %v1619_v53, %v2644_v22  ;;  %v1631_v20 = vmul.f32 %v2636_v40, %v1619_v53  ;;  %v1606_v27 = vmul.f32 %v1602_v7, %v1538_v37  ;;  %v1623_v30 = vrot.slane %v1602_v7, %v1614_v43 }
 0x36a   : > { %v2088_v15 = vpop.eup %2087  ;;  %v1652_v17 = vadd.f32 %v1639_v11, %v1628_v49  ;;  %v1653_v18 = vadd.f32 %v1639_v11, %v1629_v23  ;;  %v1643_v16 = vrot.slane %v1609_v25, %v1614_v43 }
 0x36b   : > { %v1610_v12 = vsub.f32 %v2528_v14, %v1606_v27  ;;  %v1632_v19 = vmul.f32 %v1623_v30, %v2654_v58  ;;  %v1633_v54 = vmul.f32 %v2650_v48, %v1623_v30  ;;  %v1603_v55 = vmul.f32 %v2088_v15, %v2521_v8 }
 0x36c   : > { %1660 = vst [vmem:[%s257_s9] sm:$0xff] %v1652_v17  ;;  %1661 = vst [vmem:[%s257_s9 + $0x8] sm:$0xff] %v1653_v18  ;;  %v1654_v22 = vadd.f32 %v1643_v16, %v1630_v51  ;;  %v1655_v40 = vadd.f32 %v1643_v16, %v1631_v20 }
 0x36d   : > { %v1647_v56 = vrot.slane %v1610_v12, %v1614_v43  ;;  %v1607_v57 = vmul.f32 %v1603_v55, %v1539_v13  ;;  %v1627_v52 = vrot.slane %v1603_v55, %v1614_v43 }
 0x36e   : > { %1662 = vst [vmem:[%s257_s9 + $0x10] sm:$0xff] %v1654_v22  ;;  %1663 = vst [vmem:[%s257_s9 + $0x18] sm:$0xff] %v1655_v40 }
 0x36f   : > { %v1656_v59 = vadd.f32 %v1647_v56, %v1632_v19  ;;  %v1657_v60 = vadd.f32 %v1647_v56, %v1633_v54  ;;  %v1611_v58 = vsub.f32 %v2528_v14, %v1607_v57  ;;  %v1634_v48 = vmul.f32 %v1627_v52, %v2662_v6 }
 0x370   : > { %v1635_v8 = vmul.f32 %v2656_v62, %v1627_v52 }
 0x371   : > { %1664 = vst [vmem:[%s257_s9 + $0x20] sm:$0xff] %v1656_v59  ;;  %1665 = vst [vmem:[%s257_s9 + $0x28] sm:$0xff] %v1657_v60  ;;  %v1651_v61 = vrot.slane %v1611_v58, %v1614_v43 }
 0x373   : > { %v1658_v14 = vadd.f32 %v1651_v61, %v1634_v48  ;;  %v1659_v6 = vadd.f32 %v1651_v61, %v1635_v8 }
 0x375   : > { %1666 = vst [vmem:[%s257_s9 + $0x30] sm:$0xff] %v1658_v14  ;;  %1667 = vst [vmem:[%s257_s9 + $0x38] sm:$0xff] %v1659_v6 }
 0x376   : > { %2162 = shalt.err (!%p2159_p11)
}
 0x377   : > { %s2163_s29 = scalar_lea.hbm %s2692_s12, 1024  ;;  %s2167_s20 = scalar_lea.hbm %s2742_s4, 2048 }
 0x378   : > { %p2164_p3 = scmp.ne.s32.totalorder %s2692_s12, %s2163_s29  ;;  %p2168_p2 = scmp.lt.u32.totalorder %s2692_s12, %s2742_s4 }
 0x379   : > { %p2169_p4 = scmp.lt.u32.totalorder %s2167_s20, %s2163_s29  ;;  %p2171_p13 = scmp.lt.u32.totalorder %s2163_s29, %s2692_s12 }
 0x37a   : > { %p2165_p8 = pnand %p2164_p3, %p2752_p1 }
 0x37b   : > { %p2170_p6 = por %p2169_p4, %p2168_p2 }
 0x37c   : > { %p2166_p0 = pneg %p2165_p8 }
 0x37d   : > { %p2172_p12 = por %p2171_p13, %p2170_p6 }
 0x37f   : > { %p2173_p10 = pnand %p2172_p12, %p2166_p0 }
 0x381   : > { %2176 = shalt.err (!%p2173_p10)
}
 0x382   : > { %s2226_s9 = smov 128   ;;  %s2227_s8 = smov 8  }
 0x383   : > { %2014 = dma.vmem_to_hbm [thread:$0]  (%p2752_p1), %s2694_s25, 1024, %s2692_s12, %s1669_s19, %s2226_s9, %s2226_s9, %s2227_s8  }
 0x384 PF: > { %s1698_s5 = sand.u32 1, %s2207_s15   ;;  %p2753_p5 = scmp.ne.s32.totalorder %s2748_s28, 0 }
 0x385   : > { %p2754_p7 = scmp.ge.s32.totalorder %s2219_s18, 2  ;;  %s1699_s7 = scalar_lea.sflag [#allocation4], %s1698_s5 }
 0x387   : > { %p2024_p9 = pnand %p2754_p7, %p2753_p5 }
 0x389   : > { %2202 = dma.done.wait (!%p2024_p9), %s1699_s7, 1024  }
 0x38a   : > { %2204 = vsyncadd (!%p2024_p9), %s1699_s7, 4294966272  ;;  %p20_p11 = scmp.ge.s32.totalorder %s2278_s21, 4   ;;  %s2755_s15 = smov %s2211_s16 }
 0x38b   : > { %s2756_s16 = smov %s2215_s17  ;;  %s2757_s17 = smov %s2290_s24 }
 0x38c   : > { %s2758_s18 = smov %s2278_s21  ;;  %22 = sbr.rel (!%p20_p11) target bundleno = 7 (0x7), region = 94 }
 0x393   :  { %1704 = vsyncpa [#allocation3], 1 }
 0x394   :  { %1706 = vsyncpa [#allocation3 + $0x1], 1 }
 0x395   :  { %1707 = vsyncpa [#allocation6], 1 }
 0x396   :  { %1709 = vsyncpa [#allocation6 + $0x1], 1 }
 0x397   :  { %1710 = vsyncpa [#allocation4], 1 }
 0x398   :  { %1712 = vsyncpa [#allocation4 + $0x1], 1 }

</bundles_post_ra>
